<compile_context>
chip_gen: v6e
topology: v6e:2x2x1
jax: 0.10.0
libtpu: 0.0.40
codegen_flags: <defaults>
</compile_context>

<pallas_src>
import functools

import jax
import jax.numpy as jnp
from jax.experimental import pallas as pl
from jax.experimental.pallas import tpu as pltpu


def _round_up(n, m):
    return ((n + m - 1) // m) * m


@functools.lru_cache(maxsize=1)
def _chip_info():
    """Returns (is_v7x, vmem_budget_bytes). Conservative fallback if unknown."""
    try:
        kind = jax.devices()[0].device_kind.lower()
    except Exception:
        kind = ""
    is_v7 = "v7" in kind
    if is_v7:
        budget = 48 * 1024 * 1024          # 64 MiB physical per TC -> leave headroom
    elif ("v4" in kind) or ("v5" in kind) or ("v6" in kind):
        budget = 100 * 1024 * 1024         # 128 MiB physical, single TC
    else:
        budget = 48 * 1024 * 1024          # unknown chip: be conservative
    return is_v7, budget


def _tile_config(B, D, x_itemsize, layer_dims, out_dim):
    """Static (trace-time) batch-tile and VMEM-budget selection."""
    is_v7, cap = _chip_info()

    # tm-independent bytes: bf16 weights (single-buffered) + f32 biases.
    weight_bytes = sum(2 * din * dout + 4 * dout for din, dout in layer_dims)
    max_width = max([D, out_dim] + [dout for _, dout in layer_dims])

    # Per-row VMEM bytes: double-buffered x tile, double-buffered f32 out tile,
    # live f32 intermediate h + its bf16 cast, plus headroom for compiler temps.
    per_row = (2 * x_itemsize * D
               + 2 * 4 * out_dim
               + 6 * max_width
               + 4 * max_width)

    avail = max(per_row * 8, cap - weight_bytes - (2 << 20))
    tm_cap = max(8, min(2048, (avail // per_row) // 8 * 8))

    bp8 = _round_up(B, 8)                  # pad batch only to the sublane multiple
    n_tiles = max(1, pl.cdiv(bp8, tm_cap))
    if is_v7 and bp8 >= 16:
        n_tiles = max(2, n_tiles)          # keep both v7x TensorCores busy
    tm = _round_up(pl.cdiv(bp8, n_tiles), 8)
    Bp = _round_up(bp8, tm)

    footprint = weight_bytes + tm * per_row + (4 << 20)
    vmem_limit = int(min(cap, max(footprint, 16 << 20)))
    return tm, Bp, vmem_limit


def prepare_mlp_params(weights_pt, biases, *, param_dtype=jnp.bfloat16):
    """One-time parameter prep, hoisted out of the forward pass.

    weights_pt[l]: (out_features, in_features) -> (in_features, out_features) bf16
    biases[l]:     (out_features,)             -> (1, out_features) f32
    """
    ws, bs = [], []
    for w, b in zip(weights_pt, biases):
        ws.append(jnp.asarray(w).T.astype(param_dtype))
        bs.append(jnp.asarray(b, jnp.float32).reshape(1, -1))
    return ws, bs


def _make_mlp_kernel(num_layers):
    """Kernel over one batch tile: refs = (x, w0, b0, w1, b1, ..., out)."""

    def kernel(*refs):
        x_ref = refs[0]
        o_ref = refs[-1]
        h = x_ref[...].astype(jnp.float32)
        for l in range(num_layers):
            w = refs[1 + 2 * l][...]         # (d_in, d_out), bf16
            b = refs[2 + 2 * l][...]         # (1, d_out), f32
            # bf16 MXU matmul with f32 accumulation; bias add / ReLU in f32.
            h = jnp.dot(h.astype(w.dtype), w,
                        preferred_element_type=jnp.float32) + b
            if l < num_layers - 1:           # ReLU on all but the final layer
                h = jnp.maximum(h, 0.0)
        o_ref[...] = h.astype(o_ref.dtype)

    return kernel


@jax.jit
def mlp_feature_extractor_forward(x, weights, biases):
    """Forward pass of MLPFeatureExtractor.

    x:       (B, input_dim)
    weights: prepared weights from prepare_mlp_params, each (d_in, d_out)
    biases:  prepared biases, each (1, d_out) float32
    returns  (B, output_dim) float32
    """
    B, D = x.shape
    num_layers = len(weights)
    assert num_layers == len(biases) and num_layers >= 1
    layer_dims = tuple((w.shape[0], w.shape[1]) for w in weights)
    out_dim = layer_dims[-1][1]

    tm, Bp, vmem_limit = _tile_config(B, D, x.dtype.itemsize, layer_dims, out_dim)
    if Bp != B:
        x = jnp.pad(x, ((0, Bp - B), (0, 0)))

    grid = (Bp // tm,)

    # x / out: batch-tiled, default double-buffering.
    # Weights / biases: full-array blocks with a constant index_map -> VMEM-resident;
    # single-buffered because they never change across grid steps.
    in_specs = [pl.BlockSpec((tm, D), lambda i: (i, 0))]
    args = [x]
    flops = 0
    weight_bytes = 0
    for w, b in zip(weights, biases):
        d_in, d_out = w.shape
        in_specs.append(pl.BlockSpec((d_in, d_out), lambda i: (0, 0),
                                     pipeline_mode=pl.Buffered(1)))
        in_specs.append(pl.BlockSpec((1, d_out), lambda i: (0, 0),
                                     pipeline_mode=pl.Buffered(1)))
        args.extend([w, b])
        flops += 2 * Bp * d_in * d_out
        weight_bytes += w.dtype.itemsize * d_in * d_out + 4 * d_out

    out_specs = pl.BlockSpec((tm, out_dim), lambda i: (i, 0))

    cost = pl.CostEstimate(
        flops=flops,
        transcendentals=0,
        bytes_accessed=x.dtype.itemsize * Bp * D + 4 * Bp * out_dim + weight_bytes,
    )

    out = pl.pallas_call(
        _make_mlp_kernel(num_layers),
        out_shape=jax.ShapeDtypeStruct((Bp, out_dim), jnp.float32),
        grid=grid,
        in_specs=in_specs,
        out_specs=out_specs,
        compiler_params=pltpu.CompilerParams(
            dimension_semantics=("parallel",),   # batch tiles shard across TCs on v7x
            vmem_limit_bytes=vmem_limit,
        ),
        cost_estimate=cost,
    )(*args)

    return out[:B]


if __name__ == "__main__":
    key = jax.random.PRNGKey(0)

    # Shapes consistent with MLPFeatureExtractor defaults: hidden_dims=[64, 32].
    batch, input_dim, output_dim = 8, 32, 16
    hidden_dims = [64, 32]
    dims = [input_dim] + hidden_dims + [output_dim]
    num_layers = len(dims) - 1

    keys = jax.random.split(key, 1 + 2 * num_layers)
    x = jax.random.normal(keys[0], (batch, input_dim), dtype=jnp.float32)

    # Deterministic random parameters in PyTorch layout: W (out, in), b (out,).
    weights_pt, biases_pt = [], []
    for l in range(num_layers):
        fan_in, fan_out = dims[l], dims[l + 1]
        w = jax.random.normal(keys[1 + 2 * l], (fan_out, fan_in), jnp.float32) / jnp.sqrt(fan_in)
        b = 0.1 * jax.random.normal(keys[2 + 2 * l], (fan_out,), jnp.float32)
        weights_pt.append(w)
        biases_pt.append(b)

    # One-time parameter preparation (transpose + bf16 cast), hoisted out of forward.
    weights, biases = prepare_mlp_params(weights_pt, biases_pt)

    y = mlp_feature_extractor_forward(x, weights, biases)
    y = jax.block_until_ready(y)

    # References with PyTorch semantics (x @ W.T + b, ReLU between layers):
    #  - h32: full f32 math
    #  - hbf: bf16 matmul operands with f32 accumulation (matches kernel numerics)
    h32 = x
    hbf = x
    for l, (w, b) in enumerate(zip(weights_pt, biases_pt)):
        h32 = h32 @ w.T + b
        hbf = jnp.dot(hbf.astype(jnp.bfloat16), w.T.astype(jnp.bfloat16),
                      preferred_element_type=jnp.float32) + b
        if l < num_layers - 1:
            h32 = jnp.maximum(h32, 0.0)
            hbf = jnp.maximum(hbf, 0.0)

    assert y.shape == (batch, output_dim)
    assert y.dtype == jnp.float32
    assert jnp.allclose(y, hbf, atol=2e-3, rtol=2e-3), float(jnp.max(jnp.abs(y - hbf)))
    assert jnp.allclose(y, h32, atol=5e-2, rtol=5e-2), float(jnp.max(jnp.abs(y - h32)))

    print("KERNEL_OK")
</pallas_src>

<mosaic_0001>
module attributes {stable_mosaic.version = 11 : i64} {
  func.func @kernel(%arg0: i32, %arg1: memref<8x32xf32, #tpu.memory_space<vmem>>, %arg2: memref<32x64xbf16, #tpu.memory_space<vmem>>, %arg3: memref<1x64xf32, #tpu.memory_space<vmem>>, %arg4: memref<64x32xbf16, #tpu.memory_space<vmem>>, %arg5: memref<1x32xf32, #tpu.memory_space<vmem>>, %arg6: memref<32x16xbf16, #tpu.memory_space<vmem>>, %arg7: memref<1x16xf32, #tpu.memory_space<vmem>>, %arg8: memref<8x16xf32, #tpu.memory_space<vmem>>) attributes {dimension_semantics = [#tpu.dimension_semantics<parallel>], iteration_bounds = array<i64: 1>, scalar_prefetch = 0 : i64, scratch_operands = 0 : i64, tpu.core_type = #tpu.core_type<tc>, window_params = [{transform_indices = @transform_0, window_bounds = array<i64: 8, 32>}, {pipeline_mode = #tpu.pipeline_mode<synchronous>, transform_indices = @transform_1, window_bounds = array<i64: 32, 64>}, {pipeline_mode = #tpu.pipeline_mode<synchronous>, transform_indices = @transform_2, window_bounds = array<i64: 1, 64>}, {pipeline_mode = #tpu.pipeline_mode<synchronous>, transform_indices = @transform_3, window_bounds = array<i64: 64, 32>}, {pipeline_mode = #tpu.pipeline_mode<synchronous>, transform_indices = @transform_4, window_bounds = array<i64: 1, 32>}, {pipeline_mode = #tpu.pipeline_mode<synchronous>, transform_indices = @transform_5, window_bounds = array<i64: 32, 16>}, {pipeline_mode = #tpu.pipeline_mode<synchronous>, transform_indices = @transform_6, window_bounds = array<i64: 1, 16>}, {transform_indices = @transform_7, window_bounds = array<i64: 8, 16>}]} {
    %c0 = arith.constant 0 : index
    %c0_0 = arith.constant 0 : index
    %0 = vector.load %arg1[%c0, %c0_0] : memref<8x32xf32, #tpu.memory_space<vmem>>, vector<8x32xf32>
    %c0_1 = arith.constant 0 : index
    %c0_2 = arith.constant 0 : index
    %1 = vector.load %arg2[%c0_1, %c0_2] : memref<32x64xbf16, #tpu.memory_space<vmem>>, vector<32x64xbf16>
    %c0_3 = arith.constant 0 : index
    %c0_4 = arith.constant 0 : index
    %2 = vector.load %arg3[%c0_3, %c0_4] : memref<1x64xf32, #tpu.memory_space<vmem>>, vector<1x64xf32>
    %3 = arith.truncf %0 : vector<8x32xf32> to vector<8x32xbf16>
    %cst = arith.constant dense<0.000000e+00> : vector<8x64xf32>
    %4 = tpu.matmul %3, %1, %cst {dimension_numbers = #tpu.dot_dimension_numbers<[1], [0], [0], [1], [0, 0, 1, 1], [], []>} : vector<8x32xbf16>, vector<32x64xbf16>, vector<8x64xf32> -> vector<8x64xf32>
    %5 = vector.broadcast %2 : vector<1x64xf32> to vector<8x64xf32>
    %6 = arith.addf %4, %5 : vector<8x64xf32>
    %cst_5 = arith.constant 0.000000e+00 : f32
    %7 = vector.broadcast %cst_5 : f32 to vector<8x64xf32>
    %8 = arith.maximumf %6, %7 : vector<8x64xf32>
    %c0_6 = arith.constant 0 : index
    %c0_7 = arith.constant 0 : index
    %9 = vector.load %arg4[%c0_6, %c0_7] : memref<64x32xbf16, #tpu.memory_space<vmem>>, vector<64x32xbf16>
    %c0_8 = arith.constant 0 : index
    %c0_9 = arith.constant 0 : index
    %10 = vector.load %arg5[%c0_8, %c0_9] : memref<1x32xf32, #tpu.memory_space<vmem>>, vector<1x32xf32>
    %11 = arith.truncf %8 : vector<8x64xf32> to vector<8x64xbf16>
    %cst_10 = arith.constant dense<0.000000e+00> : vector<8x32xf32>
    %12 = tpu.matmul %11, %9, %cst_10 {dimension_numbers = #tpu.dot_dimension_numbers<[1], [0], [0], [1], [0, 0, 1, 1], [], []>} : vector<8x64xbf16>, vector<64x32xbf16>, vector<8x32xf32> -> vector<8x32xf32>
    %13 = vector.broadcast %10 : vector<1x32xf32> to vector<8x32xf32>
    %14 = arith.addf %12, %13 : vector<8x32xf32>
    %cst_11 = arith.constant 0.000000e+00 : f32
    %15 = vector.broadcast %cst_11 : f32 to vector<8x32xf32>
    %16 = arith.maximumf %14, %15 : vector<8x32xf32>
    %c0_12 = arith.constant 0 : index
    %c0_13 = arith.constant 0 : index
    %17 = vector.load %arg6[%c0_12, %c0_13] : memref<32x16xbf16, #tpu.memory_space<vmem>>, vector<32x16xbf16>
    %c0_14 = arith.constant 0 : index
    %c0_15 = arith.constant 0 : index
    %18 = vector.load %arg7[%c0_14, %c0_15] : memref<1x16xf32, #tpu.memory_space<vmem>>, vector<1x16xf32>
    %19 = arith.truncf %16 : vector<8x32xf32> to vector<8x32xbf16>
    %cst_16 = arith.constant dense<0.000000e+00> : vector<8x16xf32>
    %20 = tpu.matmul %19, %17, %cst_16 {dimension_numbers = #tpu.dot_dimension_numbers<[1], [0], [0], [1], [0, 0, 1, 1], [], []>} : vector<8x32xbf16>, vector<32x16xbf16>, vector<8x16xf32> -> vector<8x16xf32>
    %21 = vector.broadcast %18 : vector<1x16xf32> to vector<8x16xf32>
    %22 = arith.addf %20, %21 : vector<8x16xf32>
    %c0_17 = arith.constant 0 : index
    %c0_18 = arith.constant 0 : index
    %23 = vector.load %arg8[%c0_17, %c0_18] : memref<8x16xf32, #tpu.memory_space<vmem>>, vector<8x16xf32>
    tpu.vector_store %arg8[%c0_17, %c0_18], %22 {strides = array<i32>} : memref<8x16xf32, #tpu.memory_space<vmem>>, vector<8x16xf32>,
    return
  }
  func.func @transform_0(%arg0: i32) -> (i32, i32) {
    %c0_i32 = arith.constant 0 : i32
    %c0_i32_0 = arith.constant 0 : i32
    return %arg0, %c0_i32 : i32, i32
  }
  func.func @transform_1(%arg0: i32) -> (i32, i32) {
    %c0_i32 = arith.constant 0 : i32
    %c0_i32_0 = arith.constant 0 : i32
    %c0_i32_1 = arith.constant 0 : i32
    return %c0_i32, %c0_i32_0 : i32, i32
  }
  func.func @transform_2(%arg0: i32) -> (i32, i32) {
    %c0_i32 = arith.constant 0 : i32
    %c0_i32_0 = arith.constant 0 : i32
    %c0_i32_1 = arith.constant 0 : i32
    return %c0_i32, %c0_i32_0 : i32, i32
  }
  func.func @transform_3(%arg0: i32) -> (i32, i32) {
    %c0_i32 = arith.constant 0 : i32
    %c0_i32_0 = arith.constant 0 : i32
    %c0_i32_1 = arith.constant 0 : i32
    return %c0_i32, %c0_i32_0 : i32, i32
  }
  func.func @transform_4(%arg0: i32) -> (i32, i32) {
    %c0_i32 = arith.constant 0 : i32
    %c0_i32_0 = arith.constant 0 : i32
    %c0_i32_1 = arith.constant 0 : i32
    return %c0_i32, %c0_i32_0 : i32, i32
  }
  func.func @transform_5(%arg0: i32) -> (i32, i32) {
    %c0_i32 = arith.constant 0 : i32
    %c0_i32_0 = arith.constant 0 : i32
    %c0_i32_1 = arith.constant 0 : i32
    return %c0_i32, %c0_i32_0 : i32, i32
  }
  func.func @transform_6(%arg0: i32) -> (i32, i32) {
    %c0_i32 = arith.constant 0 : i32
    %c0_i32_0 = arith.constant 0 : i32
    %c0_i32_1 = arith.constant 0 : i32
    return %c0_i32, %c0_i32_0 : i32, i32
  }
  func.func @transform_7(%arg0: i32) -> (i32, i32) {
    %c0_i32 = arith.constant 0 : i32
    %c0_i32_0 = arith.constant 0 : i32
    return %arg0, %c0_i32 : i32, i32
  }
}

</mosaic_0001>

<bundles_post_ra>
// kernel: mlp_feature_extractor_forward.1
= control target key start
LH: loop header
LB: loop body
LE: loop exit
PB: predicated region body
PF: predicated region fallthrough
CT: control target
= control target key end

     0   :  { %v352_v1 = vmov 0.0   ;;  %vm353_vm0 = vmmov 0   ;;  %vm53_vm1 = vcmask 261120   ;;  %s439_s0 = inlined_call_operand.vmem [shape: f32[8,32], index: 0, kind: input, shape index: {}]   ;;  %s440_s1 = inlined_call_operand.vmem [shape: bf16[32,64], index: 1, kind: input, shape index: {}]   ;;  %s441_s2 = inlined_call_operand.vmem [shape: f32[1,64], index: 2, kind: input, shape index: {}]   ;;  %s442_s3 = inlined_call_operand.vmem [shape: bf16[64,32], index: 3, kind: input, shape index: {}]   ;;  %s443_s4 = inlined_call_operand.vmem [shape: f32[1,32], index: 4, kind: input, shape index: {}]   ;;  %s444_s5 = inlined_call_operand.vmem [shape: bf16[32,16], index: 5, kind: input, shape index: {}]   ;;  %s445_s6 = inlined_call_operand.vmem [shape: f32[1,16], index: 6, kind: input, shape index: {}]   ;;  %s446_s7 = inlined_call_operand.hbm [shape: f32[8,16], index: 7, kind: output, shape index: {}]  }
   0x1   :  { %v322_v0 = vld [vmem:[%s440_s1 + $0x8] sm:$0xff]   ;;  %291 = vmatprep.subr.bf16.mxu0 %v352_v1  ;;  %v323_v2 = vld [vmem:[%s440_s1] sm:$0xff]   ;;  %299 = vmatprep.subr.bf16.mxu1 %v352_v1  ;;  %v324_v4 = vld [vmem:[%s442_s3 + $0x18] sm:$0xff]  }
   0x2   :  { %292 = vmatpush3.bf16.msra.mxu0 %v322_v0  ;;  %295 = vmatprep.mubr.msk.bf16.mxu0 %vm353_vm0, %v352_v1  ;;  %v28_v3 = vld [vmem:[%s439_s0] sm:$0xff]  ;;  %v325_v5 = vld [vmem:[%s442_s3 + $0x10] sm:$0xff]  }
   0x3   :  { %293 = vmatprep.subr.bf16.mxu0 %v352_v1  ;;  %307 = vmatprep.mubr.msk.bf16.mxu1 %vm353_vm0, %v352_v1  ;;  %v34_v6 = vpack.c.bf16 %v28_v3, %v28_v3 }
   0x4   :  { %300 = vmatpush3.bf16.msra.mxu1 %v324_v4 }
   0x5   :  { %301 = vmatprep.subr.bf16.mxu1 %v352_v1 }
   0x6   :  { %294 = vmatpush3.bf16.msra.mxu0 %v323_v2 }
   0x7   :  { %311 = vmatprep.subr.bf16.mxu0 %v352_v1 }
   0x8   :  { %12 = vsyncpa [#allocation3], 0  ;;  %302 = vmatpush3.bf16.msra.mxu1 %v325_v5  ;;  %v326_v7 = vld [vmem:[%s442_s3 + $0x8] sm:$0xff]   ;;  %v327_v8 = vld [vmem:[%s442_s3] sm:$0xff]   ;;  %vm138_vm2 = vcmask 523264   ;;  %s354_s21 = smov [#allocation2]  }
   0x9   :  { %296 = vmatmul.mubr.msk.bf16.vlgmr.msra.gmra.mxu0 %vm53_vm1, %v34_v6  ;;  %303 = vmatprep.subr.bf16.mxu1 %v352_v1  ;;  %v328_v9 = vld [vmem:[%s444_s5 + $0x8] sm:$0xff]   ;;  %v266_v10 = vld [vmem:[%s441_s2] ss:$0 sm:$0xff]  ;;  %vm250_vm3 = vcmask 130048  }
   0xa   :  { %315 = vmatprep.mubr.msk.bf16.mxu0 %vm353_vm0, %v352_v1  ;;  %312 = vmatpush3.bf16.msra.mxu0 %v328_v9  ;;  %v329_v18 = vld [vmem:[%s444_s5] sm:$0xff]   ;;  %s258_s5 = sshll.u32 %s354_s21, 4  ;;  %s259_s5 = int_to_ptr.vmem [resolvable:$true] %s258_s5 }
   0xb   :  { %313 = vmatprep.subr.bf16.mxu0 %v352_v1  ;;  %v270_v19 = vld [vmem:[%s443_s4] ss:$0 sm:$0xff]  ;;  %s330_s4 = scalar_lea.vmem %s259_s5, 128  ;;  %p335_p1 = scmp.lt.s32.totalorder %s259_s5, %s259_s5 }
   0xc   :  { %304 = vmatpush3.bf16.msra.mxu1 %v326_v7  ;;  %v276_v27 = vld [vmem:[%s445_s6] ss:$0 sm:$0xff]  ;;  %p331_p0 = scmp.ne.s32.totalorder %s259_s5, %s330_s4  ;;  %p336_p2 = scmp.lt.s32.totalorder %s330_s4, %s330_s4 }
   0xd   :  { %305 = vmatprep.subr.bf16.mxu1 %v352_v1 }
   0xe   :  { %314 = vmatpush3.bf16.msra.mxu0 %v329_v18  ;;  %p337_p3 = por %p336_p2, %p335_p1 }
  0x10   :  { %306 = vmatpush3.bf16.msra.mxu1 %v327_v8  ;;  %p338_p4 = pnand %p337_p3, %p331_p0 }
  0xc9   :  { %v91_v11 = vpop.f32.mrf.mxu0 }
  0xca   :  { %v92_v12 = vadd.f32 %v266_v10, %v91_v11 }
  0xcb   :  { %v297_v13 = vpop.f32.mrf.mxu0 }
  0xcc   :  { %v97_v14 = vmax.f32 %v92_v12, 0.0 }
  0xcd   :  { %v94_v15 = vpop.f32.mrf.mxu0 }
  0xce   :  { %v107_v16 = vpack.c.bf16 %v97_v14, %v97_v14 }
  0xcf   :  { %v298_v17 = vpop.f32.mrf.mxu0 }
  0xd0   :  { %308 = vmatmul.mubr.msk.bf16.vlgmr.msra.gmra.mxu1 %vm138_vm2, %v107_v16 }
 0x190   :  { %v176_v20 = vpop.f32.mrf.mxu1 }
 0x191   :  { %v177_v21 = vadd.f32 %v270_v19, %v176_v20 }
 0x192   :  { %v309_v22 = vpop.f32.mrf.mxu1 }
 0x193   :  { %v182_v23 = vmax.f32 %v177_v21, 0.0 }
 0x194   :  { %v179_v24 = vpop.f32.mrf.mxu1 }
 0x195   :  { %v188_v25 = vpack.c.bf16 %v182_v23, %v182_v23 }
 0x196   :  { %v310_v26 = vpop.f32.mrf.mxu1 }
 0x197   :  { %316 = vmatmul.mubr.msk.bf16.vlgmr.msra.gmra.mxu0 %vm53_vm1, %v188_v25 }
 0x257   :  { %v244_v28 = vpop.f32.mrf.mxu0 }
 0x258   :  { %v245_v29 = vadd.f32 %v276_v27, %v244_v28 }
 0x259   :  { %v317_v30 = vpop.f32.mrf.mxu0 }
 0x25a   :  { %251 = vst.msk [vmem:[#allocation2] sm:$0xff] %vm250_vm3, %v245_v29 }
 0x25b   :  { %v247_v31 = vpop.f32.mrf.mxu0 }
 0x25c   :  { %341 = shalt.err (!%p338_p4)
}
 0x25d   :  { %261 = dma.vmem_to_hbm [thread:$0]  %s259_s5, 128, %s446_s7, [#allocation3]   ;;  %v318_v32 = vpop.f32.mrf.mxu0 }
 0x25e   :  { %350 = dma.done.wait [#allocation3], 128  }
 0x25f   :  { %351 = vsyncadd [#allocation3], 4294967168 }
 0x260   :  { %265 = vsyncpa [#allocation3], 1 }

</bundles_post_ra>
